<compile_context>
chip_gen: v7x
topology: tpu7x:2x2x1
jax: 0.10.0
libtpu: 0.0.40
codegen_flags: <defaults>
</compile_context>

<pallas_src>
import functools

import numpy as np

import jax
import jax.numpy as jnp
from jax.experimental import pallas as pl
from jax.experimental.pallas import tpu as pltpu

_BF16_B = 2
_F32_B = 4


def _round_up(x, m):
    return (x + m - 1) // m * m


def _num_tiles(n, t):
    return _round_up(n, t) // t


def _vmem_capacity_bytes():
    """Physical VMEM of the current chip; conservative fallback (v7x, 64 MiB)."""
    try:
        return int(pltpu.get_tpu_info().vmem_capacity_bytes)
    except Exception:
        return 64 * 2**20


def _vmem_need_bytes(block_b, block_n, hp, out_bytes):
    """Resident-VMEM estimate for the chosen tiling (W1/b1 single-buffered)."""
    return (2 * block_b * hp * _BF16_B          # x tile (double-buffered)
            + 1 * hp * hp * _BF16_B             # W1 (pl.Buffered(1))
            + 1 * hp * _F32_B                   # b1 (pl.Buffered(1))
            + 2 * hp * block_n * _BF16_B        # W2 N-tile (double-buffered)
            + 2 * block_n * _F32_B              # b2 N-tile
            + 2 * block_b * block_n * out_bytes  # output tile
            + block_b * hp * _BF16_B)           # h scratch


def _mlp_kernel(x_ref, w1_ref, b1_ref, w2_ref, b2_ref, o_ref, h_ref):
    # fc1 + ReLU: computed once per batch tile (j == 0), reused across the
    # N-tiles of fc2 via the persistent VMEM scratch h_ref.
    # NOTE: this relies on j being the inner, sequentially iterated
    # ("arbitrary") grid axis with j == 0 visited first for every i; do not
    # reorder the grid axes or mark j parallel/core_parallel.
    @pl.when(pl.program_id(1) == 0)
    def _():
        h = jnp.dot(x_ref[...], w1_ref[...],
                    preferred_element_type=jnp.float32)   # bf16 x bf16 -> f32
        h = jnp.maximum(h + b1_ref[...], 0.0)              # bias + ReLU in f32
        h_ref[...] = h.astype(h_ref.dtype)                 # re-quantize to bf16

    # fc2 for this N-tile of W2 / the output.
    o = jnp.dot(h_ref[...], w2_ref[...], preferred_element_type=jnp.float32)
    o_ref[...] = (o + b2_ref[...]).astype(o_ref.dtype)


def prepare_mlp_filter_params(w1_t, b1, w2_t, b2):
    """Cast weights to bf16 and zero-pad the feature dim to a multiple of 256.

    Call this ONCE and reuse the result: re-preparing constant weights per
    forward call is pure HBM traffic.  Weights are in (in_features,
    out_features) layout (already transposed vs. torch.nn.Linear storage).
    Zero padding is exact: padded rows/cols contribute 0 to every dot product.
    """
    h = w1_t.shape[0]
    hp = _round_up(h, 256)
    pad2 = ((0, hp - h), (0, hp - h))
    w1p = jnp.pad(w1_t.astype(jnp.bfloat16), pad2)
    w2p = jnp.pad(w2_t.astype(jnp.bfloat16), pad2)
    b1p = jnp.pad(b1.reshape(1, -1).astype(jnp.float32), ((0, 0), (0, hp - h)))
    b2p = jnp.pad(b2.reshape(1, -1).astype(jnp.float32), ((0, 0), (0, hp - h)))
    return w1p, b1p, w2p, b2p, h


@functools.partial(
    jax.jit,
    static_argnames=("valid_h", "out_dtype", "block_b", "block_n", "vmem_limit"))
def _mlp_filter_padded(x, w1p, b1p, w2p, b2p, *, valid_h, out_dtype,
                       block_b, block_n, vmem_limit):
    b, h = x.shape
    hp = w1p.shape[0]
    bp = _round_up(b, block_b)
    nb, nn = bp // block_b, hp // block_n
    out_bytes = np.dtype(out_dtype).itemsize

    xb = jnp.pad(x.astype(jnp.bfloat16), ((0, bp - b), (0, hp - h)))

    cost = pl.CostEstimate(
        flops=4 * bp * hp * hp,                        # two B x H x H matmuls
        transcendentals=0,
        bytes_accessed=(bp * hp * _BF16_B              # x (bf16)
                        + hp * hp * _BF16_B            # W1, fetched once
                        + nb * hp * hp * _BF16_B       # W2, re-fetched per batch tile
                        + 2 * hp * _F32_B              # biases
                        + bp * hp * out_bytes))        # output writeback

    out_p = pl.pallas_call(
        _mlp_kernel,
        out_shape=jax.ShapeDtypeStruct((bp, hp), out_dtype),
        grid_spec=pltpu.PrefetchScalarGridSpec(
            num_scalar_prefetch=0,
            grid=(nb, nn),
            in_specs=[
                pl.BlockSpec((block_b, hp), lambda i, j: (i, 0)),      # x tile
                pl.BlockSpec((hp, hp), lambda i, j: (0, 0),
                             pipeline_mode=pl.Buffered(1)),            # W1 (resident)
                pl.BlockSpec((1, hp), lambda i, j: (0, 0),
                             pipeline_mode=pl.Buffered(1)),            # b1 (resident)
                pl.BlockSpec((hp, block_n), lambda i, j: (0, j)),      # W2 N-tile
                pl.BlockSpec((1, block_n), lambda i, j: (0, j)),       # b2 N-tile
            ],
            out_specs=pl.BlockSpec((block_b, block_n), lambda i, j: (i, j)),
            scratch_shapes=[pltpu.VMEM((block_b, hp), jnp.bfloat16)],  # h
        ),
        compiler_params=pltpu.CompilerParams(
            dimension_semantics=("parallel", "arbitrary"),
            vmem_limit_bytes=vmem_limit,
        ),
        cost_estimate=cost,
    )(xb, w1p, b1p, w2p, b2p)

    return out_p[:b, :valid_h]


def mlp_filter(x, params, *, out_dtype=None, block_b=None, block_n=None):
    """Fused MLPFilter forward: relu(x @ W1 + b1) @ W2 + b2.

    x:      (B, H) activations (output keeps x.dtype unless out_dtype given).
    params: result of prepare_mlp_filter_params() (call once, reuse).
    """
    w1p, b1p, w2p, b2p, h = params
    b = x.shape[0]
    assert x.shape[1] == h, (x.shape, h)
    hp = w1p.shape[0]
    if out_dtype is None:
        out_dtype = x.dtype
    out_dtype = np.dtype(out_dtype)
    out_bytes = out_dtype.itemsize

    vmem_cap = _vmem_capacity_bytes()
    budget = int(0.85 * vmem_cap)                 # leave headroom for Mosaic scratch
    big_vmem = vmem_cap >= 96 * 2**20             # v5e / v6e (128 MiB); v7x has 64 MiB

    # ---- N-tile: keep the full feature dim resident when small, else a 256-
    # aligned tile (full 256-wide MXU columns on v6e/v7x; no 128 fallback).
    if block_n is None:
        if hp <= 1024:
            block_n = hp
        elif hp % 512 == 0:
            block_n = 512
        else:
            block_n = 256

    # ---- batch tile.
    if block_b is None:
        # Large tile keeps the per-batch-tile W2 re-stream above the HBM
        # roofline knee (v6e knee ~650 flops/byte -> want >= 512 rows there).
        cap = 512 if (big_vmem and b >= 512) else 256
        block_b = min(cap, _round_up(b, 128))
        if not big_vmem:
            # v7x megacore: axis 0 is the only "parallel" axis; make sure both
            # TensorCores get at least one batch tile when B allows it.
            while (block_b > 64
                   and _num_tiles(b, block_b) < 2 <= _num_tiles(b, block_b // 2)):
                block_b //= 2

    # ---- shrink tiles until the (single-buffered-W1) working set fits VMEM.
    while (_vmem_need_bytes(block_b, block_n, hp, out_bytes) > budget
           and block_n > 256):
        block_n //= 2
    while (_vmem_need_bytes(block_b, block_n, hp, out_bytes) > budget
           and block_b > 64):
        block_b //= 2
    vmem_need = _vmem_need_bytes(block_b, block_n, hp, out_bytes)
    if vmem_need > budget:
        # TODO(synk): for very large H (resident W1 alone exceeds the VMEM
        # budget), switch to a K-tiled kernel that streams W1 as (Hp, bk) and
        # W2 as (bk, bn) tiles and accumulates fc2 into an f32 VMEM scratch.
        raise NotImplementedError(
            f"hidden={h}: resident W1 ({hp}x{hp} bf16) does not fit the "
            f"{vmem_cap >> 20} MiB VMEM budget; K-tiled path not implemented.")

    vmem_limit = int(min(budget, max(int(1.25 * vmem_need), 16 * 2**20)))

    return _mlp_filter_padded(
        x, w1p, b1p, w2p, b2p,
        valid_h=int(h), out_dtype=out_dtype,
        block_b=int(block_b), block_n=int(block_n), vmem_limit=vmem_limit)


def init_mlp_filter_params(key, hidden_size, dtype=jnp.float32):
    """Deterministic init mimicking torch.nn.Linear: U(-1/sqrt(in), 1/sqrt(in))."""
    k1, k2, k3, k4 = jax.random.split(key, 4)
    bound = 1.0 / (hidden_size ** 0.5)
    # PyTorch stores W as (out, in); we keep the transposed (in, out) layout.
    w1_t = jax.random.uniform(k1, (hidden_size, hidden_size), dtype, -bound, bound)
    b1 = jax.random.uniform(k2, (1, hidden_size), dtype, -bound, bound)
    w2_t = jax.random.uniform(k3, (hidden_size, hidden_size), dtype, -bound, bound)
    b2 = jax.random.uniform(k4, (1, hidden_size), dtype, -bound, bound)
    return w1_t, b1, w2_t, b2


if __name__ == "__main__":
    key = jax.random.PRNGKey(0)
    batch, hidden = 8, 32

    kx, kp = jax.random.split(key)
    x = jax.random.normal(kx, (batch, hidden), jnp.float32)
    w1_t, b1, w2_t, b2 = init_mlp_filter_params(kp, hidden)

    # Cast/pad the constant weights ONCE (hoisted out of the per-call path).
    params = prepare_mlp_filter_params(w1_t, b1, w2_t, b2)

    out = mlp_filter(x, params)
    out = jax.block_until_ready(out)
    assert out.shape == (batch, hidden)
    assert out.dtype == x.dtype

    # Reference mirroring the kernel's numerics: bf16 operands, f32 accum,
    # bf16 re-quantized intermediate activation.
    xb = x.astype(jnp.bfloat16)
    w1b = w1_t.astype(jnp.bfloat16)
    w2b = w2_t.astype(jnp.bfloat16)
    h_ref = jnp.dot(xb, w1b, preferred_element_type=jnp.float32) + b1
    h_ref = jnp.maximum(h_ref, 0.0).astype(jnp.bfloat16)
    ref = (jnp.dot(h_ref, w2b, preferred_element_type=jnp.float32) + b2)
    ref = ref.astype(x.dtype)

    err = float(jnp.max(jnp.abs(out - ref)))
    assert jnp.allclose(out, ref, atol=1e-2, rtol=1e-2), f"max abs err={err}"

    print("KERNEL_OK")
</pallas_src>

<mosaic_0001>
module attributes {stable_mosaic.version = 11 : i64} {
  func.func @_mlp_kernel(%arg0: i32, %arg1: i32, %arg2: memref<128x256xbf16, #tpu.memory_space<vmem>>, %arg3: memref<256x256xbf16, #tpu.memory_space<vmem>>, %arg4: memref<1x256xf32, #tpu.memory_space<vmem>>, %arg5: memref<256x256xbf16, #tpu.memory_space<vmem>>, %arg6: memref<1x256xf32, #tpu.memory_space<vmem>>, %arg7: memref<128x256xf32, #tpu.memory_space<vmem>>, %arg8: memref<128x256xbf16, #tpu.memory_space<vmem>>) attributes {dimension_semantics = [#tpu.dimension_semantics<parallel>, #tpu.dimension_semantics<arbitrary>], iteration_bounds = array<i64: 1, 1>, scalar_prefetch = 0 : i64, scratch_operands = 1 : i64, tpu.core_type = #tpu.core_type<tc>, window_params = [{transform_indices = @transform_0, window_bounds = array<i64: 128, 256>}, {pipeline_mode = #tpu.pipeline_mode<synchronous>, transform_indices = @transform_1, window_bounds = array<i64: 256, 256>}, {pipeline_mode = #tpu.pipeline_mode<synchronous>, transform_indices = @transform_2, window_bounds = array<i64: 1, 256>}, {transform_indices = @transform_3, window_bounds = array<i64: 256, 256>}, {transform_indices = @transform_4, window_bounds = array<i64: 1, 256>}, {transform_indices = @transform_5, window_bounds = array<i64: 128, 256>}]} {
    %c0_i32 = arith.constant 0 : i32
    %0 = arith.cmpi eq, %arg1, %c0_i32 : i32
    %1 = arith.extui %0 : i1 to i32
    %c0_i32_0 = arith.constant 0 : i32
    %2 = arith.cmpi ne, %1, %c0_i32_0 : i32
    scf.if %2 {
      %c0_8 = arith.constant 0 : index
      %c0_9 = arith.constant 0 : index
      %10 = vector.load %arg2[%c0_8, %c0_9] : memref<128x256xbf16, #tpu.memory_space<vmem>>, vector<128x256xbf16>
      %c0_10 = arith.constant 0 : index
      %c0_11 = arith.constant 0 : index
      %11 = vector.load %arg3[%c0_10, %c0_11] : memref<256x256xbf16, #tpu.memory_space<vmem>>, vector<256x256xbf16>
      %cst_12 = arith.constant dense<0.000000e+00> : vector<128x256xf32>
      %12 = tpu.matmul %10, %11, %cst_12 {dimension_numbers = #tpu.dot_dimension_numbers<[1], [0], [0], [1], [0, 0, 1, 1], [], []>} : vector<128x256xbf16>, vector<256x256xbf16>, vector<128x256xf32> -> vector<128x256xf32>
      %c0_13 = arith.constant 0 : index
      %c0_14 = arith.constant 0 : index
      %13 = vector.load %arg4[%c0_13, %c0_14] : memref<1x256xf32, #tpu.memory_space<vmem>>, vector<1x256xf32>
      %14 = vector.broadcast %13 : vector<1x256xf32> to vector<128x256xf32>
      %15 = arith.addf %12, %14 : vector<128x256xf32>
      %cst_15 = arith.constant 0.000000e+00 : f32
      %16 = vector.broadcast %cst_15 : f32 to vector<128x256xf32>
      %17 = arith.maximumf %15, %16 : vector<128x256xf32>
      %18 = arith.truncf %17 : vector<128x256xf32> to vector<128x256xbf16>
      %c0_16 = arith.constant 0 : index
      %c0_17 = arith.constant 0 : index
      %19 = vector.load %arg8[%c0_16, %c0_17] : memref<128x256xbf16, #tpu.memory_space<vmem>>, vector<128x256xbf16>
      tpu.vector_store %arg8[%c0_16, %c0_17], %18 {strides = array<i32>} : memref<128x256xbf16, #tpu.memory_space<vmem>>, vector<128x256xbf16>,
    } else {
    }
    %c0 = arith.constant 0 : index
    %c0_1 = arith.constant 0 : index
    %3 = vector.load %arg8[%c0, %c0_1] : memref<128x256xbf16, #tpu.memory_space<vmem>>, vector<128x256xbf16>
    %c0_2 = arith.constant 0 : index
    %c0_3 = arith.constant 0 : index
    %4 = vector.load %arg5[%c0_2, %c0_3] : memref<256x256xbf16, #tpu.memory_space<vmem>>, vector<256x256xbf16>
    %cst = arith.constant dense<0.000000e+00> : vector<128x256xf32>
    %5 = tpu.matmul %3, %4, %cst {dimension_numbers = #tpu.dot_dimension_numbers<[1], [0], [0], [1], [0, 0, 1, 1], [], []>} : vector<128x256xbf16>, vector<256x256xbf16>, vector<128x256xf32> -> vector<128x256xf32>
    %c0_4 = arith.constant 0 : index
    %c0_5 = arith.constant 0 : index
    %6 = vector.load %arg6[%c0_4, %c0_5] : memref<1x256xf32, #tpu.memory_space<vmem>>, vector<1x256xf32>
    %7 = vector.broadcast %6 : vector<1x256xf32> to vector<128x256xf32>
    %8 = arith.addf %5, %7 : vector<128x256xf32>
    %c0_6 = arith.constant 0 : index
    %c0_7 = arith.constant 0 : index
    %9 = vector.load %arg7[%c0_6, %c0_7] : memref<128x256xf32, #tpu.memory_space<vmem>>, vector<128x256xf32>
    tpu.vector_store %arg7[%c0_6, %c0_7], %8 {strides = array<i32>} : memref<128x256xf32, #tpu.memory_space<vmem>>, vector<128x256xf32>,
    return
  }
  func.func @transform_0(%arg0: i32, %arg1: i32) -> (i32, i32) {
    %c0_i32 = arith.constant 0 : i32
    %c0_i32_0 = arith.constant 0 : i32
    return %arg0, %c0_i32 : i32, i32
  }
  func.func @transform_1(%arg0: i32, %arg1: i32) -> (i32, i32) {
    %c0_i32 = arith.constant 0 : i32
    %c0_i32_0 = arith.constant 0 : i32
    %c0_i32_1 = arith.constant 0 : i32
    return %c0_i32, %c0_i32_0 : i32, i32
  }
  func.func @transform_2(%arg0: i32, %arg1: i32) -> (i32, i32) {
    %c0_i32 = arith.constant 0 : i32
    %c0_i32_0 = arith.constant 0 : i32
    %c0_i32_1 = arith.constant 0 : i32
    return %c0_i32, %c0_i32_0 : i32, i32
  }
  func.func @transform_3(%arg0: i32, %arg1: i32) -> (i32, i32) {
    %c0_i32 = arith.constant 0 : i32
    %c0_i32_0 = arith.constant 0 : i32
    return %c0_i32, %arg1 : i32, i32
  }
  func.func @transform_4(%arg0: i32, %arg1: i32) -> (i32, i32) {
    %c0_i32 = arith.constant 0 : i32
    %c0_i32_0 = arith.constant 0 : i32
    return %c0_i32, %arg1 : i32, i32
  }
  func.func @transform_5(%arg0: i32, %arg1: i32) -> (i32, i32) {
    %c0_i32 = arith.constant 0 : i32
    return %arg0, %arg1 : i32, i32
  }
}

</mosaic_0001>

<bundles_post_ra>
// kernel: _mlp_filter_padded.1
= control target key start
LH: loop header
LB: loop body
LE: loop exit
PB: predicated region body
PF: predicated region fallthrough
CT: control target
= control target key end

     0   :  { %10 = vsyncpa [#allocation4], 0  ;;  %s1444_s0 = inlined_call_operand.vmem [shape: bf16[128,256], index: 0, kind: input, shape index: {}]   ;;  %s1445_s1 = inlined_call_operand.hbm [shape: bf16[256,256], index: 1, kind: input, shape index: {}]   ;;  %s1446_s2 = inlined_call_operand.vmem [shape: f32[1,256], index: 2, kind: input, shape index: {}]   ;;  %s1447_s3 = inlined_call_operand.hbm [shape: bf16[256,256], index: 3, kind: input, shape index: {}]   ;;  %s1448_s4 = inlined_call_operand.vmem [shape: f32[1,256], index: 4, kind: input, shape index: {}]   ;;  %s1449_s5 = inlined_call_operand.vmem [shape: f32[128,256], index: 5, kind: output, shape index: {}]  }
   0x1   :  { %11 = vsyncpa [#allocation6], 0  ;;  %s1152_s18 = smov [#allocation3]   ;;  %s1104_s22 = scalar_lea.hbm %s1445_s1, 4096 }
   0x2   :  { %s19_s19 = sshll.u32 %s1152_s18, 4  ;;  %p1105_p0 = scmp.ne.s32.totalorder %s1445_s1, %s1104_s22  ;;  %s20_s19 = int_to_ptr.vmem [resolvable:$true] %s19_s19 }
   0x3   :  { %p1108_p1 = scmp.lt.u32.totalorder %s1104_s22, %s1445_s1 }
   0x5   :  { %p1110_p2 = pnand %p1108_p1, %p1105_p0 }
   0x7   :  { %1113 = shalt.err (!%p1110_p2)
}
   0x8   :  { %s1114_s27 = scalar_lea.vmem %s20_s19, 4096  ;;  %p1119_p4 = scmp.lt.s32.totalorder %s20_s19, %s20_s19 }
   0x9   :  { %p1115_p3 = scmp.ne.s32.totalorder %s20_s19, %s1114_s27  ;;  %p1120_p5 = scmp.lt.s32.totalorder %s1114_s27, %s1114_s27 }
   0xb   :  { %p1121_p6 = por %p1120_p5, %p1119_p4 }
   0xd   :  { %p1122_p7 = pnand %p1121_p6, %p1115_p3 }
   0xf   :  { %1125 = shalt.err (!%p1122_p7)
}
  0x10   :  { %s1153_s28 = smov 128   ;;  %s1154_s29 = smov 8  }
  0x11   :  { %25 = dma.hbm_to_vmem [thread:$0]  %s1445_s1, 4096, %s20_s19, [#allocation4], %s1153_s28, %s1153_s28, %s1154_s29  }
  0x12   :  { %s1155_s7 = smov [#allocation5]   ;;  %s1126_s11 = scalar_lea.hbm %s1447_s3, 4096 }
  0x13   :  { %s33_s8 = sshll.u32 %s1155_s7, 4  ;;  %p1127_p8 = scmp.ne.s32.totalorder %s1447_s3, %s1126_s11  ;;  %s34_s8 = int_to_ptr.vmem [resolvable:$true] %s33_s8 }
  0x14   :  { %p1130_p9 = scmp.lt.u32.totalorder %s1126_s11, %s1447_s3 }
  0x16   :  { %p1132_p10 = pnand %p1130_p9, %p1127_p8 }
  0x18   :  { %1135 = shalt.err (!%p1132_p10)
}
  0x19   :  { %s1136_s16 = scalar_lea.vmem %s34_s8, 4096  ;;  %p1141_p12 = scmp.lt.s32.totalorder %s34_s8, %s34_s8 }
  0x1a   :  { %p1137_p11 = scmp.ne.s32.totalorder %s34_s8, %s1136_s16  ;;  %p1142_p13 = scmp.lt.s32.totalorder %s1136_s16, %s1136_s16 }
  0x1c   :  { %p1143_p0 = por %p1142_p13, %p1141_p12 }
  0x1e   :  { %p1144_p1 = pnand %p1143_p0, %p1137_p11 }
  0x20   :  { %1147 = shalt.err (!%p1144_p1)
}
  0x21   :  { %39 = dma.hbm_to_vmem [thread:$0]  %s1447_s3, 4096, %s34_s8, [#allocation6], %s1153_s28, %s1153_s28, %s1154_s29  }
  0x22   :  { %1148 = dma.done.wait [#allocation4], 4096  }
  0x23   :  { %1149 = vsyncadd [#allocation4], 4294963200 }
  0x24   :  { %1150 = dma.done.wait [#allocation6], 4096  }
  0x25   :  { %1151 = vsyncadd [#allocation6], 4294963200  ;;  %v984_v0 = vld [vmem:[#allocation3 + $0x4] ss:$8 sps:$4 sm:$0xff]   ;;  %v986_v1 = vld [vmem:[#allocation3] ss:$8 sps:$4 sm:$0xff]  }
  0x26   :  { %352 = vmatprep.subr.bf16.mxu0 %v984_v0  ;;  %v987_v2 = vld [vmem:[#allocation3 + $0x14] ss:$8 sps:$4 sm:$0xff]   ;;  %v989_v3 = vld [vmem:[#allocation3 + $0x10] ss:$8 sps:$4 sm:$0xff]   ;;  %v990_v4 = vld [vmem:[#allocation3 + $0x24] ss:$8 sps:$4 sm:$0xff]  }
  0x27   :  { %353 = vmatpush1.bf16.msra.mxu0 %v986_v1  ;;  %v992_v5 = vld [vmem:[#allocation3 + $0x20] ss:$8 sps:$4 sm:$0xff]   ;;  %v993_v6 = vld [vmem:[#allocation3 + $0x34] ss:$8 sps:$4 sm:$0xff]   ;;  %v995_v7 = vld [vmem:[#allocation3 + $0x30] ss:$8 sps:$4 sm:$0xff]  }
  0x28   :  { %354 = vmatprep.subr.bf16.mxu0 %v987_v2  ;;  %v996_v8 = vld [vmem:[#allocation3 + $0x44] ss:$8 sps:$4 sm:$0xff]   ;;  %v998_v9 = vld [vmem:[#allocation3 + $0x40] ss:$8 sps:$4 sm:$0xff]   ;;  %v999_v10 = vld [vmem:[#allocation3 + $0x54] ss:$8 sps:$4 sm:$0xff]  }
  0x29   :  { %v1001_v11 = vld [vmem:[#allocation3 + $0x50] ss:$8 sps:$4 sm:$0xff]   ;;  %v1002_v12 = vld [vmem:[#allocation3 + $0x64] ss:$8 sps:$4 sm:$0xff]   ;;  %v1004_v14 = vld [vmem:[#allocation3 + $0x60] ss:$8 sps:$4 sm:$0xff]  }
  0x2a   :  { %v1034_v13 = vld [vmem:[%s1444_s0 + $0x4] ss:$8 sps:$4 sm:$0xff]   ;;  %v1005_v15 = vld [vmem:[#allocation3 + $0x74] ss:$8 sps:$4 sm:$0xff]   ;;  %v1007_v16 = vld [vmem:[#allocation3 + $0x70] ss:$8 sps:$4 sm:$0xff]  }
  0x2b   :  { %355 = vmatpush1.bf16.msra.mxu0 %v989_v3  ;;  %384 = vmatprep.mubr.bf16.mxu0 %v1034_v13  ;;  %v1008_v17 = vld [vmem:[#allocation3 + $0x84] ss:$8 sps:$4 sm:$0xff]   ;;  %v1010_v18 = vld [vmem:[#allocation3 + $0x80] ss:$8 sps:$4 sm:$0xff]   ;;  %v1011_v19 = vld [vmem:[#allocation3 + $0x94] ss:$8 sps:$4 sm:$0xff]  }
  0x2c   :  { %356 = vmatprep.subr.bf16.mxu0 %v990_v4  ;;  %v1056_v20 = vld [vmem:[#allocation5 + $0x4] ss:$8 sps:$4 sm:$0xff]   ;;  %v1058_v21 = vld [vmem:[#allocation5] ss:$8 sps:$4 sm:$0xff]   ;;  %v1013_v22 = vld [vmem:[#allocation3 + $0x90] ss:$8 sps:$4 sm:$0xff]  }
  0x2d   :  { %749 = vmatprep.subr.bf16.mxu1 %v1056_v20  ;;  %v1059_v23 = vld [vmem:[#allocation5 + $0x14] ss:$8 sps:$4 sm:$0xff]   ;;  %v1014_v24 = vld [vmem:[#allocation3 + $0xa4] ss:$8 sps:$4 sm:$0xff]   ;;  %v1061_v25 = vld [vmem:[#allocation5 + $0x10] ss:$8 sps:$4 sm:$0xff]  }
  0x2e   :  { %750 = vmatpush1.bf16.msra.mxu1 %v1058_v21  ;;  %v1062_v26 = vld [vmem:[#allocation5 + $0x24] ss:$8 sps:$4 sm:$0xff]   ;;  %v1016_v27 = vld [vmem:[#allocation3 + $0xa0] ss:$8 sps:$4 sm:$0xff]   ;;  %v1017_v28 = vld [vmem:[#allocation3 + $0xb4] ss:$8 sps:$4 sm:$0xff]  }
  0x2f   :  { %357 = vmatpush1.bf16.msra.mxu0 %v992_v5  ;;  %751 = vmatprep.subr.bf16.mxu1 %v1059_v23  ;;  %v1064_v29 = vld [vmem:[#allocation5 + $0x20] ss:$8 sps:$4 sm:$0xff]   ;;  %v1065_v30 = vld [vmem:[#allocation5 + $0x34] ss:$8 sps:$4 sm:$0xff]   ;;  %v1019_v31 = vld [vmem:[#allocation3 + $0xb0] ss:$8 sps:$4 sm:$0xff]  }
  0x30   :  { %358 = vmatprep.subr.bf16.mxu0 %v993_v6  ;;  %v1020_v32 = vld [vmem:[#allocation3 + $0xc4] ss:$8 sps:$4 sm:$0xff]   ;;  %v1067_v33 = vld [vmem:[#allocation5 + $0x30] ss:$8 sps:$4 sm:$0xff]   ;;  %v1022_v35 = vld [vmem:[#allocation3 + $0xc0] ss:$8 sps:$4 sm:$0xff]  }
  0x31   :  { %v1068_v34 = vld [vmem:[#allocation5 + $0x44] ss:$8 sps:$4 sm:$0xff]   ;;  %v1023_v36 = vld [vmem:[#allocation3 + $0xd4] ss:$8 sps:$4 sm:$0xff]   ;;  %v1070_v37 = vld [vmem:[#allocation5 + $0x40] ss:$8 sps:$4 sm:$0xff]  }
  0x32   :  { %752 = vmatpush1.bf16.msra.mxu1 %v1061_v25  ;;  %v1071_v38 = vld [vmem:[#allocation5 + $0x54] ss:$8 sps:$4 sm:$0xff]   ;;  %v1025_v39 = vld [vmem:[#allocation3 + $0xd0] ss:$8 sps:$4 sm:$0xff]   ;;  %v1026_v41 = vld [vmem:[#allocation3 + $0xe4] ss:$8 sps:$4 sm:$0xff]  }
  0x33   :  { %359 = vmatpush1.bf16.msra.mxu0 %v995_v7  ;;  %753 = vmatprep.subr.bf16.mxu1 %v1062_v26  ;;  %v1073_v40 = vld [vmem:[#allocation5 + $0x50] ss:$8 sps:$4 sm:$0xff]   ;;  %v1074_v42 = vld [vmem:[#allocation5 + $0x64] ss:$8 sps:$4 sm:$0xff]   ;;  %v1028_v43 = vld [vmem:[#allocation3 + $0xe0] ss:$8 sps:$4 sm:$0xff]  }
  0x34   :  { %360 = vmatprep.subr.bf16.mxu0 %v996_v8  ;;  %v1076_v44 = vld [vmem:[#allocation5 + $0x60] ss:$8 sps:$4 sm:$0xff]   ;;  %v1029_v45 = vld [vmem:[#allocation3 + $0xf4] ss:$8 sps:$4 sm:$0xff]   ;;  %v1031_v47 = vld [vmem:[#allocation3 + $0xf0] ss:$8 sps:$4 sm:$0xff]  }
  0x35   :  { %v1077_v46 = vld [vmem:[#allocation5 + $0x74] ss:$8 sps:$4 sm:$0xff]   ;;  %v1079_v48 = vld [vmem:[#allocation5 + $0x70] ss:$8 sps:$4 sm:$0xff]   ;;  %v1080_v49 = vld [vmem:[#allocation5 + $0x84] ss:$8 sps:$4 sm:$0xff]  }
  0x36   :  { %754 = vmatpush1.bf16.msra.mxu1 %v1064_v29  ;;  %v1032_v50 = vld [vmem:[%s1444_s0] ss:$8 sps:$4 sm:$0xff]   ;;  %v1035_v51 = vld [vmem:[%s1444_s0 + $0x14] ss:$8 sps:$4 sm:$0xff]   ;;  %v1085_v54 = vld [vmem:[#allocation5 + $0x90] ss:$8 sps:$4 sm:$0xff]  }
  0x37   :  { %361 = vmatpush1.bf16.msra.mxu0 %v998_v9  ;;  %755 = vmatprep.subr.bf16.mxu1 %v1065_v30  ;;  %v1082_v52 = vld [vmem:[#allocation5 + $0x80] ss:$8 sps:$4 sm:$0xff]   ;;  %v1083_v53 = vld [vmem:[#allocation5 + $0x94] ss:$8 sps:$4 sm:$0xff]   ;;  %v1086_v55 = vld [vmem:[#allocation5 + $0xa4] ss:$8 sps:$4 sm:$0xff]  }
  0x38   :  { %362 = vmatprep.subr.bf16.mxu0 %v999_v10  ;;  %v1037_v56 = vld [vmem:[%s1444_s0 + $0x10] ss:$8 sps:$4 sm:$0xff]   ;;  %v1038_v57 = vld [vmem:[%s1444_s0 + $0x24] ss:$8 sps:$4 sm:$0xff]   ;;  %v1088_v58 = vld [vmem:[#allocation5 + $0xa0] ss:$8 sps:$4 sm:$0xff]  }
  0x39   :  { %v1089_v59 = vld [vmem:[#allocation5 + $0xb4] ss:$8 sps:$4 sm:$0xff]   ;;  %v1091_v60 = vld [vmem:[#allocation5 + $0xb0] ss:$8 sps:$4 sm:$0xff]   ;;  %v1092_v61 = vld [vmem:[#allocation5 + $0xc4] ss:$8 sps:$4 sm:$0xff]  }
  0x3a   :  { %756 = vmatpush1.bf16.msra.mxu1 %v1067_v33  ;;  %v1040_v62 = vld [vmem:[%s1444_s0 + $0x20] ss:$8 sps:$4 sm:$0xff]   ;;  %v1041_v63 = vld [vmem:[%s1444_s0 + $0x34] ss:$8 sps:$4 sm:$0xff]   ;;  %v1043_v2 = vld [vmem:[%s1444_s0 + $0x30] ss:$8 sps:$4 sm:$0xff]  }
  0x3b   :  { %363 = vmatpush1.bf16.msra.mxu0 %v1001_v11  ;;  %757 = vmatprep.subr.bf16.mxu1 %v1068_v34  ;;  %v1094_v0 = vld [vmem:[#allocation5 + $0xc0] ss:$8 sps:$4 sm:$0xff]   ;;  %v1095_v1 = vld [vmem:[#allocation5 + $0xd4] ss:$8 sps:$4 sm:$0xff]   ;;  %v1044_v3 = vld [vmem:[%s1444_s0 + $0x44] ss:$8 sps:$4 sm:$0xff]  }
  0x3c   :  { %364 = vmatprep.subr.bf16.mxu0 %v1002_v12  ;;  %v1046_v4 = vld [vmem:[%s1444_s0 + $0x40] ss:$8 sps:$4 sm:$0xff]   ;;  %v1047_v5 = vld [vmem:[%s1444_s0 + $0x54] ss:$8 sps:$4 sm:$0xff]   ;;  %v1049_v6 = vld [vmem:[%s1444_s0 + $0x50] ss:$8 sps:$4 sm:$0xff]  }
  0x3d   :  { %v1050_v7 = vld [vmem:[%s1444_s0 + $0x64] ss:$8 sps:$4 sm:$0xff]   ;;  %v1052_v8 = vld [vmem:[%s1444_s0 + $0x60] ss:$8 sps:$4 sm:$0xff]   ;;  %v1053_v9 = vld [vmem:[%s1444_s0 + $0x74] ss:$8 sps:$4 sm:$0xff]  }
  0x3e   :  { %758 = vmatpush1.bf16.msra.mxu1 %v1070_v37  ;;  %v1055_v10 = vld [vmem:[%s1444_s0 + $0x70] ss:$8 sps:$4 sm:$0xff]   ;;  %v1098_v12 = vld [vmem:[#allocation5 + $0xe4] ss:$8 sps:$4 sm:$0xff]   ;;  %v1100_v13 = vld [vmem:[#allocation5 + $0xe0] ss:$8 sps:$4 sm:$0xff]  }
  0x3f   :  { %365 = vmatpush1.bf16.msra.mxu0 %v1004_v14  ;;  %759 = vmatprep.subr.bf16.mxu1 %v1071_v38  ;;  %v1097_v11 = vld [vmem:[#allocation5 + $0xd0] ss:$8 sps:$4 sm:$0xff]   ;;  %v1101_v14 = vld [vmem:[#allocation5 + $0xf4] ss:$8 sps:$4 sm:$0xff]  }
  0x40   :  { %366 = vmatprep.subr.bf16.mxu0 %v1005_v15  ;;  %v1103_v15 = vld [vmem:[#allocation5 + $0xf0] ss:$8 sps:$4 sm:$0xff]  }
  0x42   :  { %760 = vmatpush1.bf16.msra.mxu1 %v1073_v40 }
  0x43   :  { %367 = vmatpush1.bf16.msra.mxu0 %v1007_v16  ;;  %761 = vmatprep.subr.bf16.mxu1 %v1074_v42  ;;  %v102_v16 = vlaneseq }
  0x44   :  { %368 = vmatprep.subr.bf16.mxu0 %v1008_v17 }
  0x45   :  { %v1258_v17 = vshrl.u32 %v102_v16, 7 }
  0x46   :  { %762 = vmatpush1.bf16.msra.mxu1 %v1076_v44 }
  0x47   :  { %369 = vmatpush1.bf16.msra.mxu0 %v1010_v18  ;;  %763 = vmatprep.subr.bf16.mxu1 %v1077_v46  ;;  %v104_v18 = vsub.s32 0, %v1258_v17  ;;  %v108_v20 = vsub.s32 1, %v1258_v17 }
  0x48   :  { %370 = vmatprep.subr.bf16.mxu0 %v1011_v19  ;;  %v100_v19 = vld [vmem:[%s1446_s2] sm:$0x3] }
  0x49   :  { %v1267_v21 = vrot.slane %v100_v19, %v104_v18 }
  0x4a   :  { %764 = vmatpush1.bf16.msra.mxu1 %v1079_v48 }
  0x4b   :  { %371 = vmatpush1.bf16.msra.mxu0 %v1013_v22  ;;  %765 = vmatprep.subr.bf16.mxu1 %v1080_v49  ;;  %v1271_v22 = vrot.slane %v100_v19, %v108_v20 }
  0x4c   :  { %372 = vmatprep.subr.bf16.mxu0 %v1014_v24 }
  0x4e   :  { %766 = vmatpush1.bf16.msra.mxu1 %v1082_v52 }
  0x4f   :  { %373 = vmatpush1.bf16.msra.mxu0 %v1016_v27  ;;  %767 = vmatprep.subr.bf16.mxu1 %v1083_v53 }
  0x50   :  { %374 = vmatprep.subr.bf16.mxu0 %v1017_v28 }
  0x52   :  { %768 = vmatpush1.bf16.msra.mxu1 %v1085_v54 }
  0x53   :  { %375 = vmatpush1.bf16.msra.mxu0 %v1019_v31  ;;  %769 = vmatprep.subr.bf16.mxu1 %v1086_v55 }
  0x54   :  { %376 = vmatprep.subr.bf16.mxu0 %v1020_v32 }
  0x56   :  { %770 = vmatpush1.bf16.msra.mxu1 %v1088_v58 }
  0x57   :  { %377 = vmatpush1.bf16.msra.mxu0 %v1022_v35  ;;  %771 = vmatprep.subr.bf16.mxu1 %v1089_v59 }
  0x58   :  { %378 = vmatprep.subr.bf16.mxu0 %v1023_v36 }
  0x5a   :  { %772 = vmatpush1.bf16.msra.mxu1 %v1091_v60 }
  0x5b   :  { %379 = vmatpush1.bf16.msra.mxu0 %v1025_v39  ;;  %773 = vmatprep.subr.bf16.mxu1 %v1092_v61 }
  0x5c   :  { %380 = vmatprep.subr.bf16.mxu0 %v1026_v41 }
  0x5e   :  { %774 = vmatpush1.bf16.msra.mxu1 %v1094_v0 }
  0x5f   :  { %381 = vmatpush1.bf16.msra.mxu0 %v1028_v43  ;;  %775 = vmatprep.subr.bf16.mxu1 %v1095_v1 }
  0x60   :  { %382 = vmatprep.subr.bf16.mxu0 %v1029_v45 }
  0x62   :  { %776 = vmatpush1.bf16.msra.mxu1 %v1097_v11 }
  0x63   :  { %383 = vmatpush1.bf16.msra.mxu0 %v1031_v47  ;;  %777 = vmatprep.subr.bf16.mxu1 %v1098_v12 }
  0x66   :  { %385 = vmatmul.mubr.bf16.vlgmr.msra.gmra.mrb[0].mxu0 %v1032_v50  ;;  %778 = vmatpush1.bf16.msra.mxu1 %v1100_v13 }
  0x67   :  { %394 = vmatprep.mubr.bf16.mxu0 %v1035_v51  ;;  %779 = vmatprep.subr.bf16.mxu1 %v1101_v14 }
  0x6a   :  { %780 = vmatpush1.bf16.msra.mxu1 %v1103_v15 }
  0x6e   :  { %395 = vmatmul.mubr.bf16.gmra.mrb[4].mxu0 %v1037_v56 }
  0x6f   :  { %404 = vmatprep.mubr.bf16.mxu0 %v1038_v57 }
  0x76   :  { %405 = vmatmul.mubr.bf16.gmra.mrb[8].mxu0 %v1040_v62 }
  0x77   :  { %414 = vmatprep.mubr.bf16.mxu0 %v1041_v63 }
  0x7e   :  { %415 = vmatmul.mubr.bf16.gmra.mrb[12].mxu0 %v1043_v2 }
  0x7f   :  { %424 = vmatprep.mubr.bf16.mxu0 %v1044_v3 }
  0x86   :  { %425 = vmatmul.mubr.bf16.gmra.mrb[16].mxu0 %v1046_v4 }
  0x87   :  { %434 = vmatprep.mubr.bf16.mxu0 %v1047_v5 }
  0x8e   :  { %435 = vmatmul.mubr.bf16.gmra.mrb[20].mxu0 %v1049_v6 }
  0x8f   :  { %444 = vmatprep.mubr.bf16.mxu0 %v1050_v7 }
  0x96   :  { %445 = vmatmul.mubr.bf16.gmra.mrb[24].mxu0 %v1052_v8 }
  0x97   :  { %454 = vmatprep.mubr.bf16.mxu0 %v1053_v9 }
  0x9e   :  { %455 = vmatmul.mubr.bf16.gmra.mrb[28].mxu0 %v1055_v10 }
 0x139   :  { %v386_v23 = vpop.f32.mrb[0].mxu0 }
 0x13a   :  { %v387_v24 = vadd.f32 %v386_v23, %v1267_v21  ;;  %v388_v25 = vpop.f32.mrb[1].mxu0 }
 0x13b   :  { %v389_v26 = vadd.f32 %v388_v25, %v1271_v22  ;;  %v390_v27 = vpop.f32.mrb[2].mxu0 }
 0x13c   :  { %v391_v28 = vadd.f32 %v390_v27, %v1267_v21  ;;  %v392_v29 = vpop.f32.mrb[3].mxu0  ;;  %v465_v31 = vmax.f32 %v387_v24, 0.0 }
 0x13d   :  { %v393_v30 = vadd.f32 %v392_v29, %v1271_v22  ;;  %v466_v33 = vmax.f32 %v389_v26, 0.0 }
 0x13e   :  { %v467_v32 = vmax.f32 %v391_v28, 0.0 }
 0x13f   :  { %v468_v34 = vmax.f32 %v393_v30, 0.0 }
 0x140   :  { %v497_v35 = vpack.c.bf16 %v467_v32, %v465_v31 }
 0x141   :  { %v396_v36 = vpop.f32.mrb[4].mxu0  ;;  %v498_v37 = vpack.c.bf16 %v468_v34, %v466_v33 }
 0x142   :  { %v397_v38 = vadd.f32 %v396_v36, %v1267_v21  ;;  %v398_v39 = vpop.f32.mrb[5].mxu0 }
 0x143   :  { %v399_v40 = vadd.f32 %v398_v39, %v1271_v22  ;;  %v400_v41 = vpop.f32.mrb[6].mxu0  ;;  %781 = vmatprep.mubr.bf16.mxu1 %v498_v37 }
 0x144   :  { %v401_v42 = vadd.f32 %v400_v41, %v1267_v21  ;;  %v402_v43 = vpop.f32.mrb[7].mxu0  ;;  %782 = vmatmul.mubr.bf16.vlgmr.msra.gmra.mrb[0].mxu1 %v497_v35  ;;  %v469_v45 = vmax.f32 %v397_v38, 0.0 }
 0x145   :  { %v403_v44 = vadd.f32 %v402_v43, %v1271_v22  ;;  %v470_v47 = vmax.f32 %v399_v40, 0.0 }
 0x146   :  { %v471_v46 = vmax.f32 %v401_v42, 0.0 }
 0x147   :  { %v472_v48 = vmax.f32 %v403_v44, 0.0 }
 0x148   :  { %v499_v49 = vpack.c.bf16 %v471_v46, %v469_v45 }
 0x149   :  { %v500_v50 = vpack.c.bf16 %v472_v48, %v470_v47  ;;  %v406_v51 = vpop.f32.mrb[8].mxu0 }
 0x14a   :  { %v407_v52 = vadd.f32 %v406_v51, %v1267_v21  ;;  %v408_v53 = vpop.f32.mrb[9].mxu0 }
 0x14b   :  { %v409_v54 = vadd.f32 %v408_v53, %v1271_v22  ;;  %v410_v55 = vpop.f32.mrb[10].mxu0  ;;  %791 = vmatprep.mubr.bf16.mxu1 %v500_v50 }
 0x14c   :  { %v411_v56 = vadd.f32 %v410_v55, %v1267_v21  ;;  %v412_v57 = vpop.f32.mrb[11].mxu0  ;;  %792 = vmatmul.mubr.bf16.gmra.mrb[4].mxu1 %v499_v49  ;;  %v473_v59 = vmax.f32 %v407_v52, 0.0 }
 0x14d   :  { %v413_v58 = vadd.f32 %v412_v57, %v1271_v22  ;;  %v474_v61 = vmax.f32 %v409_v54, 0.0 }
 0x14e   :  { %v475_v60 = vmax.f32 %v411_v56, 0.0 }
 0x14f   :  { %v476_v62 = vmax.f32 %v413_v58, 0.0 }
 0x150   :  { %v501_v63 = vpack.c.bf16 %v475_v60, %v473_v59 }
 0x151   :  { %v502_v0 = vpack.c.bf16 %v476_v62, %v474_v61  ;;  %v416_v1 = vpop.f32.mrb[12].mxu0 }
 0x152   :  { %v417_v2 = vadd.f32 %v416_v1, %v1267_v21  ;;  %v418_v3 = vpop.f32.mrb[13].mxu0 }
 0x153   :  { %v419_v4 = vadd.f32 %v418_v3, %v1271_v22  ;;  %v420_v5 = vpop.f32.mrb[14].mxu0  ;;  %801 = vmatprep.mubr.bf16.mxu1 %v502_v0 }
 0x154   :  { %v421_v6 = vadd.f32 %v420_v5, %v1267_v21  ;;  %v422_v7 = vpop.f32.mrb[15].mxu0  ;;  %802 = vmatmul.mubr.bf16.gmra.mrb[8].mxu1 %v501_v63  ;;  %v477_v9 = vmax.f32 %v417_v2, 0.0 }
 0x155   :  { %v423_v8 = vadd.f32 %v422_v7, %v1271_v22  ;;  %v478_v11 = vmax.f32 %v419_v4, 0.0 }
 0x156   :  { %v479_v10 = vmax.f32 %v421_v6, 0.0 }
 0x157   :  { %v480_v12 = vmax.f32 %v423_v8, 0.0 }
 0x158   :  { %v503_v13 = vpack.c.bf16 %v479_v10, %v477_v9 }
 0x159   :  { %v504_v14 = vpack.c.bf16 %v480_v12, %v478_v11  ;;  %v426_v15 = vpop.f32.mrb[16].mxu0  ;;  %v577_v12 = vld [vmem:[%s1448_s4] sm:$0x3] }
 0x15a   :  { %v427_v16 = vadd.f32 %v426_v15, %v1267_v21  ;;  %v428_v19 = vpop.f32.mrb[17].mxu0 }
 0x15b   :  { %v429_v23 = vadd.f32 %v428_v19, %v1271_v22  ;;  %v430_v24 = vpop.f32.mrb[18].mxu0  ;;  %811 = vmatprep.mubr.bf16.mxu1 %v504_v14 }
 0x15c   :  { %v431_v25 = vadd.f32 %v430_v24, %v1267_v21  ;;  %v432_v26 = vpop.f32.mrb[19].mxu0  ;;  %812 = vmatmul.mubr.bf16.gmra.mrb[12].mxu1 %v503_v13  ;;  %v481_v28 = vmax.f32 %v427_v16, 0.0  ;;  %v1310_v13 = vrot.slane %v577_v12, %v104_v18 }
 0x15d   :  { %v433_v27 = vadd.f32 %v432_v26, %v1271_v22  ;;  %v482_v30 = vmax.f32 %v429_v23, 0.0 }
 0x15e   :  { %v483_v29 = vmax.f32 %v431_v25, 0.0 }
 0x15f   :  { %v484_v31 = vmax.f32 %v433_v27, 0.0 }
 0x160   :  { %v505_v32 = vpack.c.bf16 %v483_v29, %v481_v28 }
 0x161   :  { %v506_v33 = vpack.c.bf16 %v484_v31, %v482_v30  ;;  %v436_v34 = vpop.f32.mrb[20].mxu0 }
 0x162   :  { %v437_v35 = vadd.f32 %v436_v34, %v1267_v21  ;;  %v438_v36 = vpop.f32.mrb[21].mxu0 }
 0x163   :  { %v439_v37 = vadd.f32 %v438_v36, %v1271_v22  ;;  %v440_v38 = vpop.f32.mrb[22].mxu0  ;;  %821 = vmatprep.mubr.bf16.mxu1 %v506_v33 }
 0x164   :  { %v441_v39 = vadd.f32 %v440_v38, %v1267_v21  ;;  %v442_v40 = vpop.f32.mrb[23].mxu0  ;;  %822 = vmatmul.mubr.bf16.gmra.mrb[16].mxu1 %v505_v32  ;;  %v485_v42 = vmax.f32 %v437_v35, 0.0 }
 0x165   :  { %v443_v41 = vadd.f32 %v442_v40, %v1271_v22  ;;  %v486_v44 = vmax.f32 %v439_v37, 0.0 }
 0x166   :  { %v487_v43 = vmax.f32 %v441_v39, 0.0 }
 0x167   :  { %v488_v45 = vmax.f32 %v443_v41, 0.0 }
 0x168   :  { %v507_v46 = vpack.c.bf16 %v487_v43, %v485_v42 }
 0x169   :  { %v508_v47 = vpack.c.bf16 %v488_v45, %v486_v44  ;;  %v446_v48 = vpop.f32.mrb[24].mxu0 }
 0x16a   :  { %v447_v49 = vadd.f32 %v446_v48, %v1267_v21  ;;  %v448_v50 = vpop.f32.mrb[25].mxu0 }
 0x16b   :  { %v449_v51 = vadd.f32 %v448_v50, %v1271_v22  ;;  %v450_v52 = vpop.f32.mrb[26].mxu0  ;;  %831 = vmatprep.mubr.bf16.mxu1 %v508_v47 }
 0x16c   :  { %v451_v53 = vadd.f32 %v450_v52, %v1267_v21  ;;  %v452_v54 = vpop.f32.mrb[27].mxu0  ;;  %832 = vmatmul.mubr.bf16.gmra.mrb[20].mxu1 %v507_v46  ;;  %v489_v56 = vmax.f32 %v447_v49, 0.0 }
 0x16d   :  { %v453_v55 = vadd.f32 %v452_v54, %v1271_v22  ;;  %v490_v58 = vmax.f32 %v449_v51, 0.0 }
 0x16e   :  { %v491_v57 = vmax.f32 %v451_v53, 0.0 }
 0x16f   :  { %v492_v59 = vmax.f32 %v453_v55, 0.0 }
 0x170   :  { %v509_v60 = vpack.c.bf16 %v491_v57, %v489_v56 }
 0x171   :  { %v510_v61 = vpack.c.bf16 %v492_v59, %v490_v58  ;;  %v456_v62 = vpop.f32.mrb[28].mxu0 }
 0x172   :  { %v457_v63 = vadd.f32 %v456_v62, %v1267_v21  ;;  %v458_v0 = vpop.f32.mrb[29].mxu0 }
 0x173   :  { %v459_v1 = vadd.f32 %v458_v0, %v1271_v22  ;;  %v460_v2 = vpop.f32.mrb[30].mxu0  ;;  %841 = vmatprep.mubr.bf16.mxu1 %v510_v61 }
 0x174   :  { %v461_v3 = vadd.f32 %v460_v2, %v1267_v21  ;;  %v462_v4 = vpop.f32.mrb[31].mxu0  ;;  %842 = vmatmul.mubr.bf16.gmra.mrb[24].mxu1 %v509_v60  ;;  %v493_v6 = vmax.f32 %v457_v63, 0.0  ;;  %v1314_v21 = vrot.slane %v577_v12, %v108_v20 }
 0x175   :  { %v463_v5 = vadd.f32 %v462_v4, %v1271_v22  ;;  %v494_v8 = vmax.f32 %v459_v1, 0.0 }
 0x176   :  { %v495_v7 = vmax.f32 %v461_v3, 0.0 }
 0x177   :  { %v496_v9 = vmax.f32 %v463_v5, 0.0 }
 0x178   :  { %v511_v10 = vpack.c.bf16 %v495_v7, %v493_v6 }
 0x179   :  { %v512_v11 = vpack.c.bf16 %v496_v9, %v494_v8 }
 0x17b   :  { %851 = vmatprep.mubr.bf16.mxu1 %v512_v11 }
 0x17c   :  { %852 = vmatmul.mubr.bf16.gmra.mrb[28].mxu1 %v511_v10 }
 0x217   :  { %v783_v22 = vpop.f32.mrb[0].mxu1 }
 0x218   :  { %v784_v14 = vadd.f32 %v783_v22, %v1310_v13  ;;  %v785_v15 = vpop.f32.mrb[1].mxu1 }
 0x219   :  { %v786_v16 = vadd.f32 %v785_v15, %v1314_v21  ;;  %v787_v19 = vpop.f32.mrb[2].mxu1 }
 0x21a   :  { %862 = vst [vmem:[%s1449_s5] sm:$0xff] %v784_v14  ;;  %v788_v23 = vadd.f32 %v787_v19, %v1310_v13  ;;  %v789_v24 = vpop.f32.mrb[3].mxu1 }
 0x21b   :  { %863 = vst [vmem:[%s1449_s5 + $0x8] sm:$0xff] %v786_v16  ;;  %v790_v17 = vadd.f32 %v789_v24, %v1314_v21 }
 0x21c   :  { %864 = vst [vmem:[%s1449_s5 + $0x10] sm:$0xff] %v788_v23 }
 0x21d   :  { %865 = vst [vmem:[%s1449_s5 + $0x18] sm:$0xff] %v790_v17 }
 0x21f   :  { %v793_v18 = vpop.f32.mrb[4].mxu1 }
 0x220   :  { %v794_v20 = vadd.f32 %v793_v18, %v1310_v13  ;;  %v795_v25 = vpop.f32.mrb[5].mxu1 }
 0x221   :  { %v796_v26 = vadd.f32 %v795_v25, %v1314_v21  ;;  %v797_v27 = vpop.f32.mrb[6].mxu1 }
 0x222   :  { %866 = vst [vmem:[%s1449_s5 + $0x20] sm:$0xff] %v794_v20  ;;  %v798_v28 = vadd.f32 %v797_v27, %v1310_v13  ;;  %v799_v29 = vpop.f32.mrb[7].mxu1 }
 0x223   :  { %867 = vst [vmem:[%s1449_s5 + $0x28] sm:$0xff] %v796_v26  ;;  %v800_v30 = vadd.f32 %v799_v29, %v1314_v21 }
 0x224   :  { %868 = vst [vmem:[%s1449_s5 + $0x30] sm:$0xff] %v798_v28 }
 0x225   :  { %869 = vst [vmem:[%s1449_s5 + $0x38] sm:$0xff] %v800_v30 }
 0x227   :  { %v803_v31 = vpop.f32.mrb[8].mxu1 }
 0x228   :  { %v804_v32 = vadd.f32 %v803_v31, %v1310_v13  ;;  %v805_v33 = vpop.f32.mrb[9].mxu1 }
 0x229   :  { %v806_v34 = vadd.f32 %v805_v33, %v1314_v21  ;;  %v807_v35 = vpop.f32.mrb[10].mxu1 }
 0x22a   :  { %870 = vst [vmem:[%s1449_s5 + $0x40] sm:$0xff] %v804_v32  ;;  %v808_v36 = vadd.f32 %v807_v35, %v1310_v13  ;;  %v809_v37 = vpop.f32.mrb[11].mxu1 }
 0x22b   :  { %871 = vst [vmem:[%s1449_s5 + $0x48] sm:$0xff] %v806_v34  ;;  %v810_v38 = vadd.f32 %v809_v37, %v1314_v21 }
 0x22c   :  { %872 = vst [vmem:[%s1449_s5 + $0x50] sm:$0xff] %v808_v36 }
 0x22d   :  { %873 = vst [vmem:[%s1449_s5 + $0x58] sm:$0xff] %v810_v38 }
 0x22f   :  { %v813_v39 = vpop.f32.mrb[12].mxu1 }
 0x230   :  { %v814_v40 = vadd.f32 %v813_v39, %v1310_v13  ;;  %v815_v41 = vpop.f32.mrb[13].mxu1 }
 0x231   :  { %v816_v42 = vadd.f32 %v815_v41, %v1314_v21  ;;  %v817_v43 = vpop.f32.mrb[14].mxu1 }
 0x232   :  { %874 = vst [vmem:[%s1449_s5 + $0x60] sm:$0xff] %v814_v40  ;;  %v818_v44 = vadd.f32 %v817_v43, %v1310_v13  ;;  %v819_v45 = vpop.f32.mrb[15].mxu1 }
 0x233   :  { %875 = vst [vmem:[%s1449_s5 + $0x68] sm:$0xff] %v816_v42  ;;  %v820_v46 = vadd.f32 %v819_v45, %v1314_v21 }
 0x234   :  { %876 = vst [vmem:[%s1449_s5 + $0x70] sm:$0xff] %v818_v44 }
 0x235   :  { %877 = vst [vmem:[%s1449_s5 + $0x78] sm:$0xff] %v820_v46 }
 0x237   :  { %v823_v47 = vpop.f32.mrb[16].mxu1 }
 0x238   :  { %v824_v48 = vadd.f32 %v823_v47, %v1310_v13  ;;  %v825_v49 = vpop.f32.mrb[17].mxu1 }
 0x239   :  { %v826_v50 = vadd.f32 %v825_v49, %v1314_v21  ;;  %v827_v51 = vpop.f32.mrb[18].mxu1 }
 0x23a   :  { %878 = vst [vmem:[%s1449_s5 + $0x80] sm:$0xff] %v824_v48  ;;  %v828_v52 = vadd.f32 %v827_v51, %v1310_v13  ;;  %v829_v53 = vpop.f32.mrb[19].mxu1 }
 0x23b   :  { %879 = vst [vmem:[%s1449_s5 + $0x88] sm:$0xff] %v826_v50  ;;  %v830_v54 = vadd.f32 %v829_v53, %v1314_v21 }
 0x23c   :  { %880 = vst [vmem:[%s1449_s5 + $0x90] sm:$0xff] %v828_v52 }
 0x23d   :  { %881 = vst [vmem:[%s1449_s5 + $0x98] sm:$0xff] %v830_v54 }
 0x23f   :  { %v833_v55 = vpop.f32.mrb[20].mxu1 }
 0x240   :  { %v834_v56 = vadd.f32 %v833_v55, %v1310_v13  ;;  %v835_v57 = vpop.f32.mrb[21].mxu1 }
 0x241   :  { %v836_v58 = vadd.f32 %v835_v57, %v1314_v21  ;;  %v837_v59 = vpop.f32.mrb[22].mxu1 }
 0x242   :  { %882 = vst [vmem:[%s1449_s5 + $0xa0] sm:$0xff] %v834_v56  ;;  %v838_v60 = vadd.f32 %v837_v59, %v1310_v13  ;;  %v839_v61 = vpop.f32.mrb[23].mxu1 }
 0x243   :  { %883 = vst [vmem:[%s1449_s5 + $0xa8] sm:$0xff] %v836_v58  ;;  %v840_v62 = vadd.f32 %v839_v61, %v1314_v21 }
 0x244   :  { %884 = vst [vmem:[%s1449_s5 + $0xb0] sm:$0xff] %v838_v60 }
 0x245   :  { %885 = vst [vmem:[%s1449_s5 + $0xb8] sm:$0xff] %v840_v62 }
 0x247   :  { %v843_v63 = vpop.f32.mrb[24].mxu1 }
 0x248   :  { %v844_v0 = vadd.f32 %v843_v63, %v1310_v13  ;;  %v845_v1 = vpop.f32.mrb[25].mxu1 }
 0x249   :  { %v846_v2 = vadd.f32 %v845_v1, %v1314_v21  ;;  %v847_v3 = vpop.f32.mrb[26].mxu1 }
 0x24a   :  { %886 = vst [vmem:[%s1449_s5 + $0xc0] sm:$0xff] %v844_v0  ;;  %v848_v4 = vadd.f32 %v847_v3, %v1310_v13  ;;  %v849_v5 = vpop.f32.mrb[27].mxu1 }
 0x24b   :  { %887 = vst [vmem:[%s1449_s5 + $0xc8] sm:$0xff] %v846_v2  ;;  %v850_v6 = vadd.f32 %v849_v5, %v1314_v21 }
 0x24c   :  { %888 = vst [vmem:[%s1449_s5 + $0xd0] sm:$0xff] %v848_v4 }
 0x24d   :  { %889 = vst [vmem:[%s1449_s5 + $0xd8] sm:$0xff] %v850_v6 }
 0x24f   :  { %v853_v7 = vpop.f32.mrb[28].mxu1 }
 0x250   :  { %v854_v8 = vadd.f32 %v853_v7, %v1310_v13  ;;  %v855_v9 = vpop.f32.mrb[29].mxu1 }
 0x251   :  { %v856_v10 = vadd.f32 %v855_v9, %v1314_v21  ;;  %v857_v11 = vpop.f32.mrb[30].mxu1 }
 0x252   :  { %890 = vst [vmem:[%s1449_s5 + $0xe0] sm:$0xff] %v854_v8  ;;  %v858_v12 = vadd.f32 %v857_v11, %v1310_v13  ;;  %v859_v22 = vpop.f32.mrb[31].mxu1 }
 0x253   :  { %891 = vst [vmem:[%s1449_s5 + $0xe8] sm:$0xff] %v856_v10  ;;  %v860_v14 = vadd.f32 %v859_v22, %v1314_v21 }
 0x254   :  { %892 = vst [vmem:[%s1449_s5 + $0xf0] sm:$0xff] %v858_v12 }
 0x255   :  { %893 = vst [vmem:[%s1449_s5 + $0xf8] sm:$0xff] %v860_v14 }
 0x256   :  { %898 = vsyncpa [#allocation4], 1 }
 0x257   :  { %899 = vsyncpa [#allocation6], 1 }

</bundles_post_ra>
